<compile_context>
chip_gen: v5e
topology: v5e:2x2
jax: 0.10.0
libtpu: 0.0.40
codegen_flags: <defaults>
</compile_context>

<pallas_src>
import functools

import jax
import jax.numpy as jnp
from jax.experimental import pallas as pl
from jax.experimental.pallas import tpu as pltpu


OUT_PAD = 128     # lane-dense padded logits width (real logits = first 3 cols)
HALF = 64         # inside a tap block: lanes [0:64) tanh, [64:128) relu
C_BLK = 128       # lane width of one tap block (keeps tap slabs lane-aligned)
NEG = -1e30       # additive mask value for invalid pooling positions


def _round_up(x, m):
    return ((x + m - 1) // m) * m


def _pick_batch_tile(B, S_pad):
    """Batch tile: a multiple of 8 dividing B, grown while >=2 grid steps
    remain (keeps both v7x TCs busy and lets the embedded-text DMA
    double-buffer) and the main-matmul M = B_t*S_pad stays modest."""
    if B % 8 != 0:
        return B          # full-batch block fallback (single grid step)
    bt = 8
    while (B % (bt * 2) == 0 and B // (bt * 2) >= 2
           and (bt * 2) * S_pad <= 512):
        bt *= 2
    return bt


# -----------------------------------------------------------------------------
# Pallas kernel: packed gated conv + masked max-pool + fused 2-layer MLP head.
# -----------------------------------------------------------------------------
def _make_gcae_kernel(seq_len, kmax):
    S = seq_len
    Kmax = kmax

    def kernel(emb_ref, wall_ref, bias_ref, mask_ref, wl_ref, bl_ref,
               wo_ref, bo_ref, out_ref):
        C_total = wall_ref.shape[1]            # Kmax * 128
        B_t = out_ref.shape[0]
        S_pad = emb_ref.shape[0] // B_t

        # One lane-dense MXU matmul covering every branch / size / tap:
        #   [B_t*S_pad, E] @ [E, Kmax*128]   (bf16 operands, f32 accumulation)
        p = jnp.dot(emb_ref[...], wall_ref[...],
                    preferred_element_type=jnp.float32)
        p3 = p.reshape(B_t, S_pad, C_total)    # S_pad % 8 == 0 -> cheap reshape

        # Tap combination: Kmax-1 VPU adds of lane-aligned 128-wide slabs.
        # The sequence was zero-padded to S_pad >= S + Kmax - 1, so every
        # shifted slice has length S; windows that run past the real text are
        # masked out before pooling.
        acc = p3[:, 0:S, 0:C_BLK]
        for k in range(1, Kmax):
            acc = acc + p3[:, k:k + S, k * C_BLK:(k + 1) * C_BLK]

        # Single dense epilogue for ALL kernel sizes: bias(+gate) add, tanh on
        # the tanh half, relu on the relu half, gated product, masked max-pool.
        z = acc + bias_ref[...]                           # [B_t, S, 128]
        t = jnp.tanh(z[:, :, :HALF])                      # [B_t, S, 64] (EUP)
        r = jnp.maximum(z[:, :, HALF:], 0.0)              # [B_t, S, 64] (VPU)
        prod = t * r                                      # gated conv output
        pooled = jnp.max(prod + mask_ref[...], axis=1)    # [B_t, 64]

        # TODO(synk): nn.Dropout is identity at inference; training-mode RNG
        # mask not implemented here.
        # Fused head: ONE dot per layer (wl rows nK*F..63 are zero padding).
        hidden = jnp.maximum(
            jnp.dot(pooled.astype(wl_ref.dtype), wl_ref[...],
                    preferred_element_type=jnp.float32) + bl_ref[...], 0.0)
        out = jnp.dot(hidden.astype(wo_ref.dtype), wo_ref[...],
                      preferred_element_type=jnp.float32) + bo_ref[...]
        out_ref[...] = out.astype(out_ref.dtype)          # [B_t, OUT_PAD]

    return kernel


# -----------------------------------------------------------------------------
# Parameter construction (deterministic, matches the shapes from __init__).
# -----------------------------------------------------------------------------
def init_gcae_params(key, input_size, embedding_dim, n_filters, kernel_sizes):
    n_keys = 4 + 4 * len(kernel_sizes) + 4
    keys = jax.random.split(key, n_keys)
    ki = iter(range(n_keys))

    def nrm(k, shape, scale=0.1):
        return scale * jax.random.normal(keys[k], shape, dtype=jnp.float32)

    params = {}
    params['embedding'] = nrm(next(ki), (input_size, embedding_dim), 1.0)
    params['V'] = jax.random.uniform(keys[next(ki)],
                                     (embedding_dim, n_filters),
                                     dtype=jnp.float32)
    params['convs_tanh'] = []
    params['convs_relu'] = []
    for K in kernel_sizes:
        # torch Conv2d weight [F, 1, K, E]  -> stored as [K, E, F]
        wt = nrm(next(ki), (n_filters, K, embedding_dim)).transpose(1, 2, 0)
        bt = nrm(next(ki), (1, n_filters))
        wr = nrm(next(ki), (n_filters, K, embedding_dim)).transpose(1, 2, 0)
        br = nrm(next(ki), (1, n_filters))
        params['convs_tanh'].append((wt, bt))
        params['convs_relu'].append((wr, br))
    nk_f = len(kernel_sizes) * n_filters
    # torch Linear weight [out, in] -> stored transposed as [in, out]
    params['linear_w'] = nrm(next(ki), (input_size, nk_f)).T      # [nk_f, vocab]
    params['linear_b'] = nrm(next(ki), (1, input_size))
    params['out_w'] = nrm(next(ki), (3, input_size)).T            # [vocab, 3]
    params['out_b'] = nrm(next(ki), (1, 3))
    return params


# -----------------------------------------------------------------------------
# Forward wrapper: gather / gate / weight packing in plain JAX (glue), fused
# conv+gate+pool+MLP in the batch-tiled Pallas kernel.
# -----------------------------------------------------------------------------
@functools.partial(jax.jit, static_argnames=('kernel_sizes',))
def gcae_forward(params, text_indices, target_indices, kernel_sizes):
    bf = jnp.bfloat16
    B, S = text_indices.shape
    emb_table = params['embedding'].astype(bf)   # bf16 table: half gather bytes
    E = emb_table.shape[1]
    F = params['V'].shape[1]
    nK = len(kernel_sizes)
    Kmax = max(kernel_sizes)
    vocab = params['linear_w'].shape[1]
    V_pad = _round_up(vocab, 128)
    if nK * F > HALF:
        raise ValueError("packed layout assumes len(kernel_sizes)*n_filters <= 64")

    S_pad = _round_up(S + Kmax - 1, 8)

    # --- glue: embedding gather, zero-pad the sequence, flatten to 2-D -------
    embedded = jnp.take(emb_table, text_indices, axis=0)              # [B,S,E]
    embedded = jnp.pad(embedded, ((0, 0), (0, S_pad - S), (0, 0)))
    emb2 = embedded.reshape(B * S_pad, E)                             # [B*S_pad,E]

    # --- aspect gate hoisted out of the kernel, folded into the relu bias ----
    t_rows = jnp.take(emb_table, target_indices, axis=0).astype(jnp.float32)
    t_mean = jnp.mean(t_rows, axis=0, keepdims=True)                  # [1,E]
    gate = jnp.dot(t_mean.astype(bf), params['V'].astype(bf),
                   preferred_element_type=jnp.float32)                # [1,F]

    # --- pack both branches, all sizes and all taps into one tap-major RHS ---
    # tap k occupies lanes [k*128,(k+1)*128): tanh blocks at [i*F,(i+1)*F),
    # relu blocks at [64+i*F, 64+(i+1)*F); missing taps (k >= K_i) stay zero.
    C_total = Kmax * C_BLK
    w_all = jnp.zeros((E, C_total), jnp.float32)
    bias = jnp.zeros((1, C_BLK), jnp.float32)
    mask = jnp.zeros((S, HALF), jnp.float32)
    pos = jnp.arange(S)[:, None]
    for i, K in enumerate(kernel_sizes):
        wt, bt = params['convs_tanh'][i]          # wt: [K,E,F], bt: [1,F]
        wr, br = params['convs_relu'][i]
        for k in range(K):
            col = k * C_BLK
            w_all = w_all.at[:, col + i * F: col + (i + 1) * F].set(wt[k])
            w_all = w_all.at[:, col + HALF + i * F:
                             col + HALF + (i + 1) * F].set(wr[k])
        bias = bias.at[:, i * F:(i + 1) * F].set(bt)
        bias = bias.at[:, HALF + i * F: HALF + (i + 1) * F].set(br + gate)
        L = S - K + 1
        mask = mask.at[:, i * F:(i + 1) * F].set(
            jnp.broadcast_to(jnp.where(pos < L, 0.0, NEG), (S, F)))
    w_all = w_all.astype(bf)

    # --- lane-dense head: vocab / logits padded to multiples of 128 ----------
    wl = jnp.zeros((HALF, V_pad), jnp.float32).at[:nK * F, :vocab].set(
        params['linear_w']).astype(bf)
    bl = jnp.zeros((1, V_pad), jnp.float32).at[:, :vocab].set(params['linear_b'])
    wo = jnp.zeros((V_pad, OUT_PAD), jnp.float32).at[:vocab, :3].set(
        params['out_w']).astype(bf)
    bo = jnp.zeros((1, OUT_PAD), jnp.float32).at[:, :3].set(params['out_b'])

    # --- batch-tiled grid -----------------------------------------------------
    B_t = _pick_batch_tile(B, S_pad)
    grid = (B // B_t,)

    kernel = _make_gcae_kernel(S, Kmax)

    def const(shape):
        return pl.BlockSpec(shape, lambda b: (0, 0))

    flops = (2 * B * S_pad * E * C_total          # packed conv matmul
             + 2 * B * HALF * V_pad               # head layer 1
             + 2 * B * V_pad * OUT_PAD)           # head layer 2
    transcendentals = B * S * HALF
    bytes_accessed = (B * S_pad * E * 2 + E * C_total * 2
                      + HALF * V_pad * 2 + V_pad * OUT_PAD * 2
                      + (C_BLK + S * HALF + V_pad + OUT_PAD) * 4
                      + B * OUT_PAD * 4)

    # TODO(synk): for production vocab sizes on v7x (64 MiB VMEM), tile V_pad
    # with a second grid axis (or single-buffer wl/wo) instead of keeping the
    # whole head resident.
    out_padded = pl.pallas_call(
        kernel,
        out_shape=jax.ShapeDtypeStruct((B, OUT_PAD), jnp.float32),
        grid=grid,
        in_specs=[
            pl.BlockSpec((B_t * S_pad, E), lambda b: (b, 0)),   # embedded rows
            const((E, C_total)),                                # packed conv RHS
            const((1, C_BLK)),                                  # bt | br+gate
            const((S, HALF)),                                   # pool mask
            const((HALF, V_pad)),                               # linear_w (pad)
            const((1, V_pad)),                                  # linear_b (pad)
            const((V_pad, OUT_PAD)),                            # out_w (pad)
            const((1, OUT_PAD)),                                # out_b (pad)
        ],
        out_specs=pl.BlockSpec((B_t, OUT_PAD), lambda b: (b, 0)),
        compiler_params=pltpu.CompilerParams(
            dimension_semantics=("parallel",),
            vmem_limit_bytes=32 * 1024 * 1024),
        cost_estimate=pl.CostEstimate(
            flops=flops, transcendentals=transcendentals,
            bytes_accessed=bytes_accessed),
    )(emb2, w_all, bias, mask, wl, bl, wo, bo)

    return out_padded[:, :3]


# -----------------------------------------------------------------------------
# Pure-JAX reference (same bf16-operand / f32-accumulate dtype policy).
# -----------------------------------------------------------------------------
def gcae_reference(params, text_indices, target_indices, kernel_sizes):
    bf = jnp.bfloat16
    emb_table = params['embedding'].astype(bf)
    embedded = jnp.take(emb_table, text_indices, axis=0)
    t_rows = jnp.take(emb_table, target_indices, axis=0).astype(jnp.float32)
    t_mean = jnp.mean(t_rows, axis=0, keepdims=True)
    gate = jnp.dot(t_mean.astype(bf), params['V'].astype(bf),
                   preferred_element_type=jnp.float32)               # [1, F]
    pooled = []
    for (wt, bt), (wr, br), K in zip(params['convs_tanh'],
                                     params['convs_relu'], kernel_sizes):
        L = embedded.shape[1] - K + 1
        acc_t = sum(jnp.einsum('ble,ef->blf', embedded[:, k:k + L, :],
                               wt[k].astype(bf),
                               preferred_element_type=jnp.float32)
                    for k in range(K)) + bt
        acc_r = sum(jnp.einsum('ble,ef->blf', embedded[:, k:k + L, :],
                               wr[k].astype(bf),
                               preferred_element_type=jnp.float32)
                    for k in range(K)) + br + gate
        pooled.append(jnp.max(jnp.tanh(acc_t) * jnp.maximum(acc_r, 0.0), axis=1))
    cat = jnp.concatenate(pooled, axis=1)
    hidden = jnp.maximum(
        jnp.dot(cat.astype(bf), params['linear_w'].astype(bf),
                preferred_element_type=jnp.float32) + params['linear_b'], 0.0)
    return (jnp.dot(hidden.astype(bf), params['out_w'].astype(bf),
                    preferred_element_type=jnp.float32) + params['out_b'])


if __name__ == "__main__":
    # Small, forward-consistent shapes (batch chosen so the grid has >1 step).
    input_size = 64          # vocab
    embedding_dim = 32
    n_filters = 8
    kernel_sizes = (2, 3, 4)
    batch, seq_len, tgt_len = 16, 16, 3

    key = jax.random.PRNGKey(0)
    k_params, k_text, k_tgt = jax.random.split(key, 3)

    params = init_gcae_params(k_params, input_size, embedding_dim,
                              n_filters, kernel_sizes)

    text_indices = jax.random.randint(k_text, (batch, seq_len), 0, input_size,
                                      dtype=jnp.int32)
    # Mirrors `target = x[2]; target = target[1]` in the PyTorch forward:
    target_matrix = jax.random.randint(k_tgt, (2, tgt_len), 0, input_size,
                                       dtype=jnp.int32)
    x = (text_indices, None, target_matrix)
    target_indices = x[2][1]

    out = gcae_forward(params, x[0], target_indices, kernel_sizes)
    out = jax.block_until_ready(out)

    ref = gcae_reference(params, x[0], target_indices, kernel_sizes)
    assert out.shape == (batch, 3)
    assert jnp.allclose(out, ref, atol=2e-2, rtol=2e-2), (out, ref)

    print("KERNEL_OK")
</pallas_src>

<mosaic_0001>
module attributes {stable_mosaic.version = 11 : i64} {
  func.func @kernel(%arg0: i32, %arg1: memref<192x32xbf16, #tpu.memory_space<vmem>>, %arg2: memref<32x512xbf16, #tpu.memory_space<vmem>>, %arg3: memref<1x128xf32, #tpu.memory_space<vmem>>, %arg4: memref<16x64xf32, #tpu.memory_space<vmem>>, %arg5: memref<64x128xbf16, #tpu.memory_space<vmem>>, %arg6: memref<1x128xf32, #tpu.memory_space<vmem>>, %arg7: memref<128x128xbf16, #tpu.memory_space<vmem>>, %arg8: memref<1x128xf32, #tpu.memory_space<vmem>>, %arg9: memref<8x128xf32, #tpu.memory_space<vmem>>) attributes {dimension_semantics = [#tpu.dimension_semantics<parallel>], iteration_bounds = array<i64: 2>, scalar_prefetch = 0 : i64, scratch_operands = 0 : i64, tpu.core_type = #tpu.core_type<tc>, window_params = [{transform_indices = @transform_0, window_bounds = array<i64: 192, 32>}, {pipeline_mode = #tpu.pipeline_mode<synchronous>, transform_indices = @transform_1, window_bounds = array<i64: 32, 512>}, {pipeline_mode = #tpu.pipeline_mode<synchronous>, transform_indices = @transform_2, window_bounds = array<i64: 1, 128>}, {pipeline_mode = #tpu.pipeline_mode<synchronous>, transform_indices = @transform_3, window_bounds = array<i64: 16, 64>}, {pipeline_mode = #tpu.pipeline_mode<synchronous>, transform_indices = @transform_4, window_bounds = array<i64: 64, 128>}, {pipeline_mode = #tpu.pipeline_mode<synchronous>, transform_indices = @transform_5, window_bounds = array<i64: 1, 128>}, {pipeline_mode = #tpu.pipeline_mode<synchronous>, transform_indices = @transform_6, window_bounds = array<i64: 128, 128>}, {pipeline_mode = #tpu.pipeline_mode<synchronous>, transform_indices = @transform_7, window_bounds = array<i64: 1, 128>}, {transform_indices = @transform_8, window_bounds = array<i64: 8, 128>}]} {
    %c0 = arith.constant 0 : index
    %c0_0 = arith.constant 0 : index
    %0 = vector.load %arg1[%c0, %c0_0] : memref<192x32xbf16, #tpu.memory_space<vmem>>, vector<192x32xbf16>
    %c0_1 = arith.constant 0 : index
    %c0_2 = arith.constant 0 : index
    %1 = vector.load %arg2[%c0_1, %c0_2] : memref<32x512xbf16, #tpu.memory_space<vmem>>, vector<32x512xbf16>
    %cst = arith.constant dense<0.000000e+00> : vector<192x512xf32>
    %2 = tpu.matmul %0, %1, %cst {dimension_numbers = #tpu.dot_dimension_numbers<[1], [0], [0], [1], [0, 0, 1, 1], [], []>} : vector<192x32xbf16>, vector<32x512xbf16>, vector<192x512xf32> -> vector<192x512xf32>
    %3 = vector.shape_cast %2 : vector<192x512xf32> to vector<8x24x512xf32>
    %4 = vector.extract_strided_slice %3 {offsets = [0, 0, 0], sizes = [8, 16, 128], strides = [1, 1, 1]} : vector<8x24x512xf32> to vector<8x16x128xf32>
    %5 = vector.extract_strided_slice %3 {offsets = [0, 1, 128], sizes = [8, 16, 128], strides = [1, 1, 1]} : vector<8x24x512xf32> to vector<8x16x128xf32>
    %6 = arith.addf %4, %5 : vector<8x16x128xf32>
    %7 = vector.extract_strided_slice %3 {offsets = [0, 2, 256], sizes = [8, 16, 128], strides = [1, 1, 1]} : vector<8x24x512xf32> to vector<8x16x128xf32>
    %8 = arith.addf %6, %7 : vector<8x16x128xf32>
    %9 = vector.extract_strided_slice %3 {offsets = [0, 3, 384], sizes = [8, 16, 128], strides = [1, 1, 1]} : vector<8x24x512xf32> to vector<8x16x128xf32>
    %10 = arith.addf %8, %9 : vector<8x16x128xf32>
    %c0_3 = arith.constant 0 : index
    %c0_4 = arith.constant 0 : index
    %11 = vector.load %arg3[%c0_3, %c0_4] : memref<1x128xf32, #tpu.memory_space<vmem>>, vector<1x128xf32>
    %12 = vector.shape_cast %11 : vector<1x128xf32> to vector<1x1x128xf32>
    %13 = vector.broadcast %12 : vector<1x1x128xf32> to vector<8x16x128xf32>
    %14 = arith.addf %10, %13 : vector<8x16x128xf32>
    %15 = vector.extract_strided_slice %14 {offsets = [0, 0, 0], sizes = [8, 16, 64], strides = [1, 1, 1]} : vector<8x16x128xf32> to vector<8x16x64xf32>
    %16 = math.tanh %15 : vector<8x16x64xf32>
    %17 = vector.extract_strided_slice %14 {offsets = [0, 0, 64], sizes = [8, 16, 64], strides = [1, 1, 1]} : vector<8x16x128xf32> to vector<8x16x64xf32>
    %cst_5 = arith.constant 0.000000e+00 : f32
    %18 = vector.broadcast %cst_5 : f32 to vector<8x16x64xf32>
    %19 = arith.maximumf %17, %18 : vector<8x16x64xf32>
    %20 = arith.mulf %16, %19 : vector<8x16x64xf32>
    %c0_6 = arith.constant 0 : index
    %c0_7 = arith.constant 0 : index
    %21 = vector.load %arg4[%c0_6, %c0_7] : memref<16x64xf32, #tpu.memory_space<vmem>>, vector<16x64xf32>
    %22 = vector.shape_cast %21 : vector<16x64xf32> to vector<1x16x64xf32>
    %23 = vector.broadcast %22 : vector<1x16x64xf32> to vector<8x16x64xf32>
    %24 = arith.addf %20, %23 : vector<8x16x64xf32>
    %cst_8 = arith.constant dense<0xFF800000> : vector<8x64xf32>
    %25 = vector.multi_reduction <maximumf>, %24, %cst_8 [1] : vector<8x16x64xf32> to vector<8x64xf32>
    %26 = arith.truncf %25 : vector<8x64xf32> to vector<8x64xbf16>
    %c0_9 = arith.constant 0 : index
    %c0_10 = arith.constant 0 : index
    %27 = vector.load %arg5[%c0_9, %c0_10] : memref<64x128xbf16, #tpu.memory_space<vmem>>, vector<64x128xbf16>
    %cst_11 = arith.constant dense<0.000000e+00> : vector<8x128xf32>
    %28 = tpu.matmul %26, %27, %cst_11 {dimension_numbers = #tpu.dot_dimension_numbers<[1], [0], [0], [1], [0, 0, 1, 1], [], []>} : vector<8x64xbf16>, vector<64x128xbf16>, vector<8x128xf32> -> vector<8x128xf32>
    %c0_12 = arith.constant 0 : index
    %c0_13 = arith.constant 0 : index
    %29 = vector.load %arg6[%c0_12, %c0_13] : memref<1x128xf32, #tpu.memory_space<vmem>>, vector<1x128xf32>
    %30 = vector.broadcast %29 : vector<1x128xf32> to vector<8x128xf32>
    %31 = arith.addf %28, %30 : vector<8x128xf32>
    %cst_14 = arith.constant 0.000000e+00 : f32
    %32 = vector.broadcast %cst_14 : f32 to vector<8x128xf32>
    %33 = arith.maximumf %31, %32 : vector<8x128xf32>
    %34 = arith.truncf %33 : vector<8x128xf32> to vector<8x128xbf16>
    %c0_15 = arith.constant 0 : index
    %c0_16 = arith.constant 0 : index
    %35 = vector.load %arg7[%c0_15, %c0_16] : memref<128x128xbf16, #tpu.memory_space<vmem>>, vector<128x128xbf16>
    %cst_17 = arith.constant dense<0.000000e+00> : vector<8x128xf32>
    %36 = tpu.matmul %34, %35, %cst_17 {dimension_numbers = #tpu.dot_dimension_numbers<[1], [0], [0], [1], [0, 0, 1, 1], [], []>} : vector<8x128xbf16>, vector<128x128xbf16>, vector<8x128xf32> -> vector<8x128xf32>
    %c0_18 = arith.constant 0 : index
    %c0_19 = arith.constant 0 : index
    %37 = vector.load %arg8[%c0_18, %c0_19] : memref<1x128xf32, #tpu.memory_space<vmem>>, vector<1x128xf32>
    %38 = vector.broadcast %37 : vector<1x128xf32> to vector<8x128xf32>
    %39 = arith.addf %36, %38 : vector<8x128xf32>
    %c0_20 = arith.constant 0 : index
    %c0_21 = arith.constant 0 : index
    %40 = vector.load %arg9[%c0_20, %c0_21] : memref<8x128xf32, #tpu.memory_space<vmem>>, vector<8x128xf32>
    tpu.vector_store %arg9[%c0_20, %c0_21], %39 {strides = array<i32>} : memref<8x128xf32, #tpu.memory_space<vmem>>, vector<8x128xf32>,
    return
  }
  func.func @transform_0(%arg0: i32) -> (i32, i32) {
    %c0_i32 = arith.constant 0 : i32
    %c0_i32_0 = arith.constant 0 : i32
    return %arg0, %c0_i32 : i32, i32
  }
  func.func @transform_1(%arg0: i32) -> (i32, i32) {
    %c0_i32 = arith.constant 0 : i32
    %c0_i32_0 = arith.constant 0 : i32
    %c0_i32_1 = arith.constant 0 : i32
    return %c0_i32, %c0_i32_0 : i32, i32
  }
  func.func @transform_2(%arg0: i32) -> (i32, i32) {
    %c0_i32 = arith.constant 0 : i32
    %c0_i32_0 = arith.constant 0 : i32
    %c0_i32_1 = arith.constant 0 : i32
    return %c0_i32, %c0_i32_0 : i32, i32
  }
  func.func @transform_3(%arg0: i32) -> (i32, i32) {
    %c0_i32 = arith.constant 0 : i32
    %c0_i32_0 = arith.constant 0 : i32
    %c0_i32_1 = arith.constant 0 : i32
    return %c0_i32, %c0_i32_0 : i32, i32
  }
  func.func @transform_4(%arg0: i32) -> (i32, i32) {
    %c0_i32 = arith.constant 0 : i32
    %c0_i32_0 = arith.constant 0 : i32
    %c0_i32_1 = arith.constant 0 : i32
    return %c0_i32, %c0_i32_0 : i32, i32
  }
  func.func @transform_5(%arg0: i32) -> (i32, i32) {
    %c0_i32 = arith.constant 0 : i32
    %c0_i32_0 = arith.constant 0 : i32
    %c0_i32_1 = arith.constant 0 : i32
    return %c0_i32, %c0_i32_0 : i32, i32
  }
  func.func @transform_6(%arg0: i32) -> (i32, i32) {
    %c0_i32 = arith.constant 0 : i32
    %c0_i32_0 = arith.constant 0 : i32
    %c0_i32_1 = arith.constant 0 : i32
    return %c0_i32, %c0_i32_0 : i32, i32
  }
  func.func @transform_7(%arg0: i32) -> (i32, i32) {
    %c0_i32 = arith.constant 0 : i32
    %c0_i32_0 = arith.constant 0 : i32
    %c0_i32_1 = arith.constant 0 : i32
    return %c0_i32, %c0_i32_0 : i32, i32
  }
  func.func @transform_8(%arg0: i32) -> (i32, i32) {
    %c0_i32 = arith.constant 0 : i32
    %c0_i32_0 = arith.constant 0 : i32
    return %arg0, %c0_i32 : i32, i32
  }
}

</mosaic_0001>

<bundles_post_ra>
// kernel: gcae_forward.1
= control target key start
LH: loop header
LB: loop body
LE: loop exit
PB: predicated region body
PF: predicated region fallthrough
CT: control target
= control target key end

     0   :  { %s1802_s27 = smov 0   ;;  %s2168_s0 = inlined_call_operand.vmem [shape: bf16[384,32], index: 0, kind: input, shape index: {}]   ;;  %s2169_s1 = inlined_call_operand.vmem [shape: bf16[32,512], index: 1, kind: input, shape index: {}]   ;;  %s2170_s2 = inlined_call_operand.vmem [shape: f32[1,128], index: 2, kind: input, shape index: {}]   ;;  %s2171_s3 = inlined_call_operand.vmem [shape: f32[16,64], index: 3, kind: input, shape index: {}]   ;;  %s2172_s4 = inlined_call_operand.vmem [shape: bf16[64,128], index: 4, kind: input, shape index: {}]   ;;  %s2173_s5 = inlined_call_operand.vmem [shape: f32[1,128], index: 5, kind: input, shape index: {}]   ;;  %s2174_s6 = inlined_call_operand.vmem [shape: bf16[128,128], index: 6, kind: input, shape index: {}]   ;;  %s2175_s7 = inlined_call_operand.vmem [shape: f32[1,128], index: 7, kind: input, shape index: {}]   ;;  %s2176_s8 = inlined_call_operand.vmem [shape: f32[16,128], index: 8, kind: output, shape index: {}]  }
   0x1 LB: > { %s1808_s28 = sadd.s32 4294967295, %s1754_s27   ;;  %p1490_p0 = scmp.ge.s32.totalorder %s1754_s27, 1  ;;  %s1754_s27 = sphi %s1802_s27, %s18_s27  }
   0x2   : > { %p263_p1 = scmp.lt.s32.totalorder %s1754_s27, 3 }
   0x4   : > { %p264_p2 = pnand %p1490_p0, %p263_p1 }
   0x5   : > { %s296_s15 = smul.u32 (!%p264_p2), 24, %s1808_s28  ;;  %s1756_s26 = smov (!%p264_p2), 64  }
   0x6   : > { %267 = sbr.rel (%p264_p2) target bundleno = 756 (0x2f4), region = 52  ;;  %p302_p4 = scmp.lt.s32.totalorder (!%p264_p2), %s1808_s28, 1 }
   0x7   : > { %p297_p3 = scmp.lt.s32.totalorder (!%p264_p2), %s296_s15, 47 }
   0xb   : > { %v1688_v0 = vld [vmem:[%s2169_s1 + $0x24] sm:$0xf]  ;;  %v1561_v1 = vld [vmem:[%s2169_s1 + $0x30] sm:$0xf0]  ;;  %v1567_v2 = vld [vmem:[%s2169_s1 + $0x28] sm:$0xf] }
   0xc   : > { %v1564_v3 = vor.u32 %v1688_v0, %v1561_v1  ;;  %v1691_v4 = vld [vmem:[%s2169_s1 + $0x34] sm:$0xf0]  ;;  %v1689_v5 = vld [vmem:[%s2169_s1 + $0x2c] sm:$0xf]  ;;  %v1569_v6 = vld [vmem:[%s2169_s1 + $0x38] sm:$0xf0] }
   0xd   : > { %v1568_v7 = vor.u32 %v1691_v4, %v1567_v2  ;;  %v1572_v8 = vor.u32 %v1689_v5, %v1569_v6  ;;  %v1684_v9 = vld [vmem:[%s2169_s1 + $0x4] sm:$0xf]  ;;  %v1545_v10 = vld [vmem:[%s2169_s1 + $0x10] sm:$0xf0]  ;;  %v1551_v11 = vld [vmem:[%s2169_s1 + $0x8] sm:$0xf] }
   0xe   : > { %543 = vmatpush.bf16.msra.mxu1 %v1564_v3  ;;  %v1548_v12 = vor.u32 %v1684_v9, %v1545_v10  ;;  %v1687_v13 = vld [vmem:[%s2169_s1 + $0x14] sm:$0xf0]  ;;  %v1685_v14 = vld [vmem:[%s2169_s1 + $0xc] sm:$0xf]  ;;  %v1553_v15 = vld [vmem:[%s2169_s1 + $0x18] sm:$0xf0] }
   0xf   : > { %612 = vmatpush.bf16.msra.mxu2 %v1568_v7  ;;  %681 = vmatpush.bf16.msra.mxu3 %v1572_v8  ;;  %v1552_v16 = vor.u32 %v1687_v13, %v1551_v11  ;;  %v1556_v17 = vor.u32 %v1685_v14, %v1553_v15  ;;  %v1559_v18 = vld [vmem:[%s2169_s1 + $0x20] sm:$0xf]  ;;  %v1690_v19 = vld [vmem:[%s2169_s1 + $0x2c] sm:$0xf0]  ;;  %s2178_s15 = smov (!%p297_p3, %s296_s15), 47  ;;  %vm439_vm0 = vcmask 261120  }
  0x10   : > { %v1560_v20 = vor.u32 %v1690_v19, %v1559_v18  ;;  %v1543_v21 = vld [vmem:[%s2169_s1] sm:$0xf]  ;;  %v1686_v22 = vld [vmem:[%s2169_s1 + $0xc] sm:$0xf0]  ;;  %s1491_s20 = sshll.u32 %s2178_s15, 2  ;;  %vm768_vm1 = vcmask 1046528  }
  0x11   : > { %v1544_v23 = vor.u32 %v1686_v22, %v1543_v21  ;;  %s1864_s23 = scalar_lea.vmem %s2168_s0, %s1491_s20  ;;  %vm865_vm2 = vcmask 1045504   ;;  %vm962_vm3 = vcmask 1044480   ;;  %v1917_v55 = vld [vmem:[%s2170_s2] ss:$0 sm:$0xff]  ;;  %vm1185_vm4 = vcmask 523264   ;;  %s2180_s28 = smov (!%p302_p4, %s1808_s28), 1 }
  0x12   : > { %544 = vmatpush.bf16.msra.mxu1 %v1548_v12  ;;  %482 = vmatpush.bf16.msra.mxu0 %v1560_v20  ;;  %v1672_v24 = vld [vmem:[%s1864_s23] sm:$0xff]  ;;  %v1673_v25 = vld [vmem:[%s1864_s23 + $0x8] sm:$0xff]  ;;  %v1674_v26 = vld [vmem:[%s1864_s23 + $0x10] sm:$0xff]  ;;  %vm1294_vm5 = vcmask 1041409   ;;  %vm1296_vm6 = vcmask 1042434   ;;  %vm1298_vm7 = vcmask 1043459  }
  0x13   : > { %613 = vmatpush.bf16.msra.mxu2 %v1552_v16  ;;  %682 = vmatpush.bf16.msra.mxu3 %v1556_v17  ;;  %v1675_v27 = vld [vmem:[%s1864_s23 + $0x18] sm:$0xff]  ;;  %v1676_v28 = vld [vmem:[%s1864_s23 + $0x20] sm:$0xff]  ;;  %v1677_v29 = vld [vmem:[%s1864_s23 + $0x28] sm:$0xff]  ;;  %vm1300_vm8 = vcmask 1044484   ;;  %vm1302_vm9 = vcmask 1045509   ;;  %vm1304_vm10 = vcmask 1046534  }
  0x14   : > { %v1678_v30 = vld [vmem:[%s1864_s23 + $0x30] sm:$0xff]  ;;  %v1679_v31 = vld [vmem:[%s1864_s23 + $0x38] sm:$0xff]  ;;  %v1680_v32 = vld [vmem:[%s1864_s23 + $0x40] sm:$0xff]  ;;  %vm1306_vm11 = vcmask 1047559   ;;  %s1492_s17 = sshll.u32 %s2180_s28, 3 }
  0x15   : > { %1585 = vmatmul.msk.bf16.vlgmr.msra.gmra.mxu1 %vm439_vm0, %v1672_v24  ;;  %v1681_v46 = vld [vmem:[%s1864_s23 + $0x48] sm:$0xff]  ;;  %v1682_v11 = vld [vmem:[%s1864_s23 + $0x50] sm:$0xff]  ;;  %s305_s22 = scalar_lea.vmem %s2176_s8, %s1492_s17 }
  0x16   : > { %483 = vmatpush.bf16.msra.mxu0 %v1544_v23  ;;  %1597 = vmatmul.msk.bf16.vlgmr.msra.gmra.mxu2 %vm439_vm0, %v1672_v24 }
  0x17   : > { %1609 = vmatmul.msk.bf16.vlgmr.msra.gmra.mxu3 %vm439_vm0, %v1672_v24 }
  0x19   : > { %1573 = vmatmul.msk.bf16.vlgmr.msra.gmra.mxu0 %vm439_vm0, %v1672_v24 }
  0x25   : > { %1586 = vmatmul.msk.bf16.gmra.mxu1 %vm439_vm0, %v1673_v25 }
  0x26   : > { %1598 = vmatmul.msk.bf16.gmra.mxu2 %vm439_vm0, %v1673_v25 }
  0x27   : > { %1610 = vmatmul.msk.bf16.gmra.mxu3 %vm439_vm0, %v1673_v25 }
  0x29   : > { %1574 = vmatmul.msk.bf16.gmra.mxu0 %vm439_vm0, %v1673_v25 }
  0x35   : > { %1587 = vmatmul.msk.bf16.gmra.mxu1 %vm439_vm0, %v1674_v26 }
  0x36   : > { %1599 = vmatmul.msk.bf16.gmra.mxu2 %vm439_vm0, %v1674_v26 }
  0x37   : > { %1611 = vmatmul.msk.bf16.gmra.mxu3 %vm439_vm0, %v1674_v26 }
  0x39   : > { %1575 = vmatmul.msk.bf16.gmra.mxu0 %vm439_vm0, %v1674_v26 }
  0x45   : > { %1588 = vmatmul.msk.bf16.gmra.mxu1 %vm439_vm0, %v1675_v27 }
  0x46   : > { %1600 = vmatmul.msk.bf16.gmra.mxu2 %vm439_vm0, %v1675_v27 }
  0x47   : > { %1612 = vmatmul.msk.bf16.gmra.mxu3 %vm439_vm0, %v1675_v27 }
  0x49   : > { %1576 = vmatmul.msk.bf16.gmra.mxu0 %vm439_vm0, %v1675_v27 }
  0x55   : > { %1589 = vmatmul.msk.bf16.gmra.mxu1 %vm439_vm0, %v1676_v28 }
  0x56   : > { %1601 = vmatmul.msk.bf16.gmra.mxu2 %vm439_vm0, %v1676_v28 }
  0x57   : > { %1613 = vmatmul.msk.bf16.gmra.mxu3 %vm439_vm0, %v1676_v28 }
  0x59   : > { %1577 = vmatmul.msk.bf16.gmra.mxu0 %vm439_vm0, %v1676_v28 }
  0x65   : > { %1590 = vmatmul.msk.bf16.gmra.mxu1 %vm439_vm0, %v1677_v29 }
  0x66   : > { %1602 = vmatmul.msk.bf16.gmra.mxu2 %vm439_vm0, %v1677_v29 }
  0x67   : > { %1614 = vmatmul.msk.bf16.gmra.mxu3 %vm439_vm0, %v1677_v29 }
  0x69   : > { %1578 = vmatmul.msk.bf16.gmra.mxu0 %vm439_vm0, %v1677_v29 }
  0x75   : > { %1591 = vmatmul.msk.bf16.gmra.mxu1 %vm439_vm0, %v1678_v30 }
  0x76   : > { %1603 = vmatmul.msk.bf16.gmra.mxu2 %vm439_vm0, %v1678_v30 }
  0x77   : > { %1615 = vmatmul.msk.bf16.gmra.mxu3 %vm439_vm0, %v1678_v30 }
  0x79   : > { %1579 = vmatmul.msk.bf16.gmra.mxu0 %vm439_vm0, %v1678_v30 }
  0x85   : > { %1592 = vmatmul.msk.bf16.gmra.mxu1 %vm439_vm0, %v1679_v31 }
  0x86   : > { %1604 = vmatmul.msk.bf16.gmra.mxu2 %vm439_vm0, %v1679_v31 }
  0x87   : > { %1616 = vmatmul.msk.bf16.gmra.mxu3 %vm439_vm0, %v1679_v31 }
  0x89   : > { %1580 = vmatmul.msk.bf16.gmra.mxu0 %vm439_vm0, %v1679_v31 }
  0x92   : > { %v546_v33 = vpop.f32.mrf.mxu1 }
  0x93   : > { %v769_v40 = vrot.slane %v546_v33, 1 }
  0x95   : > { %1593 = vmatmul.msk.bf16.gmra.mxu1 %vm439_vm0, %v1680_v32 }
  0x96   : > { %v485_v34 = vpop.f32.mrf.mxu0  ;;  %1605 = vmatmul.msk.bf16.gmra.mxu2 %vm439_vm0, %v1680_v32 }
  0x97   : > { %1617 = vmatmul.msk.bf16.gmra.mxu3 %vm439_vm0, %v1680_v32 }
  0x99   : > { %1581 = vmatmul.msk.bf16.gmra.mxu0 %vm439_vm0, %v1680_v32  ;;  %v615_v35 = vpop.f32.mrf.mxu2 }
  0x9a   : > { %v684_v36 = vpop.f32.mrf.mxu3  ;;  %v548_v37 = vpop.f32.mrf.mxu1  ;;  %v866_v43 = vrot.slane %v615_v35, 2 }
  0x9b   : > { %v770_v38 = vrot.slane %v548_v37, 1  ;;  %v963_v50 = vrot.slane %v684_v36, 3  ;;  %v1683_v37 = vld [vmem:[%s1864_s23 + $0x58] sm:$0xff] }
  0x9d   : > { %v771_v41 = vsel %vm768_vm1, %v769_v40, %v770_v38 }
  0x9e   : > { %v487_v39 = vpop.f32.mrf.mxu0  ;;  %v825_v47 = vadd.f32 %v771_v41, %v485_v34 }
  0xa1   : > { %v617_v42 = vpop.f32.mrf.mxu2 }
  0xa2   : > { %v867_v44 = vrot.slane %v617_v42, 2  ;;  %v686_v45 = vpop.f32.mrf.mxu3  ;;  %v551_v49 = vpop.f32.mrf.mxu1 }
  0xa3   : > { %v964_v48 = vrot.slane %v686_v45, 3  ;;  %v772_v52 = vrot.slane %v551_v49, 1 }
  0xa4   : > { %v868_v51 = vsel %vm865_vm2, %v866_v43, %v867_v44 }
  0xa5   : > { %v922_v54 = vadd.f32 %v868_v51, %v825_v47  ;;  %v965_v56 = vsel %vm962_vm3, %v963_v50, %v964_v48  ;;  %1594 = vmatmul.msk.bf16.gmra.mxu1 %vm439_vm0, %v1681_v46  ;;  %v773_v58 = vsel %vm768_vm1, %v770_v38, %v772_v52 }
  0xa6   : > { %v490_v53 = vpop.f32.mrf.mxu0  ;;  %1606 = vmatmul.msk.bf16.gmra.mxu2 %vm439_vm0, %v1681_v46  ;;  %v826_v63 = vadd.f32 %v773_v58, %v487_v39 }
  0xa7   : > { %1618 = vmatmul.msk.bf16.gmra.mxu3 %vm439_vm0, %v1681_v46  ;;  %v1019_v57 = vadd.f32 %v965_v56, %v922_v54 }
  0xa9   : > { %1582 = vmatmul.msk.bf16.gmra.mxu0 %vm439_vm0, %v1681_v46  ;;  %v620_v59 = vpop.f32.mrf.mxu2  ;;  %v1926_v60 = vadd.f32 %v1917_v55, %v1019_v57 }
  0xaa   : > { %v869_v61 = vrot.slane %v620_v59, 2  ;;  %v689_v62 = vpop.f32.mrf.mxu3  ;;  %v553_v1 = vpop.f32.mrf.mxu1 }
  0xab   : > { %v966_v0 = vrot.slane %v689_v62, 3  ;;  %v1071_v2 = vmax.f32 %v1926_v60, 0.0  ;;  %v774_v16 = vrot.slane %v553_v1, 1  ;;  %1716 = vtanh.f32 %v1926_v60 }
  0xac   : > { %v870_v3 = vsel %vm865_vm2, %v867_v44, %v869_v61 }
  0xad   : > { %v923_v5 = vadd.f32 %v870_v3, %v826_v63  ;;  %1103 = vrot.lane.b32.xlu0 %v1071_v2, %s1756_s26  ;;  %v967_v6 = vsel %vm962_vm3, %v964_v48, %v966_v0 }
  0xae   : > { %v491_v4 = vpop.f32.mrf.mxu0 }
  0xaf   : > { %v1020_v7 = vadd.f32 %v967_v6, %v923_v5 }
  0xb1   : > { %v622_v8 = vpop.f32.mrf.mxu2  ;;  %v1933_v9 = vadd.f32 %v1917_v55, %v1020_v7 }
  0xb2   : > { %v691_v10 = vpop.f32.mrf.mxu3  ;;  %v556_v12 = vpop.f32.mrf.mxu1  ;;  %v871_v19 = vrot.slane %v622_v8, 2 }
  0xb3   : > { %v1072_v13 = vmax.f32 %v1933_v9, 0.0  ;;  %v775_v14 = vrot.slane %v556_v12, 1  ;;  %v968_v25 = vrot.slane %v691_v10, 3  ;;  %1718 = vtanh.f32 %v1933_v9 }
  0xb5   : > { %1105 = vrot.lane.b32.xlu0 %v1072_v13, %s1756_s26  ;;  %1595 = vmatmul.msk.bf16.gmra.mxu1 %vm439_vm0, %v1682_v11  ;;  %v776_v17 = vsel %vm768_vm1, %v774_v16, %v775_v14 }
  0xb6   : > { %v494_v15 = vpop.f32.mrf.mxu0  ;;  %1607 = vmatmul.msk.bf16.gmra.mxu2 %vm439_vm0, %v1682_v11  ;;  %v827_v22 = vadd.f32 %v776_v17, %v491_v4 }
  0xb7   : > { %1619 = vmatmul.msk.bf16.gmra.mxu3 %vm439_vm0, %v1682_v11 }
  0xb9   : > { %1583 = vmatmul.msk.bf16.gmra.mxu0 %vm439_vm0, %v1682_v11  ;;  %v625_v18 = vpop.f32.mrf.mxu2 }
  0xba   : > { %v872_v20 = vrot.slane %v625_v18, 2  ;;  %v694_v21 = vpop.f32.mrf.mxu3  ;;  %v558_v24 = vpop.f32.mrf.mxu1 }
  0xbb   : > { %v969_v23 = vrot.slane %v694_v21, 3  ;;  %v777_v27 = vrot.slane %v558_v24, 1 }
  0xbc   : > { %v873_v26 = vsel %vm865_vm2, %v871_v19, %v872_v20 }
  0xbd   : > { %v924_v29 = vadd.f32 %v873_v26, %v827_v22  ;;  %v970_v30 = vsel %vm962_vm3, %v968_v25, %v969_v23  ;;  %v778_v32 = vsel %vm768_vm1, %v775_v14, %v777_v27 }
  0xbe   : > { %v496_v28 = vpop.f32.mrf.mxu0  ;;  %v828_v38 = vadd.f32 %v778_v32, %v494_v15 }
  0xbf   : > { %v1021_v31 = vadd.f32 %v970_v30, %v924_v29 }
  0xc1   : > { %v627_v33 = vpop.f32.mrf.mxu2  ;;  %v1947_v34 = vadd.f32 %v1917_v55, %v1021_v31 }
  0xc2   : > { %v874_v35 = vrot.slane %v627_v33, 2  ;;  %v696_v36 = vpop.f32.mrf.mxu3  ;;  %v561_v40 = vpop.f32.mrf.mxu1 }
  0xc3   : > { %v971_v39 = vrot.slane %v696_v36, 3  ;;  %v1073_v41 = vmax.f32 %v1947_v34, 0.0  ;;  %v779_v54 = vrot.slane %v561_v40, 1  ;;  %1720 = vtanh.f32 %v1947_v34  ;;  %v1694_v34 = vld [vmem:[%s2172_s4 + $0x10] sm:$0xff] }
  0xc4   : > { %v875_v42 = vsel %vm865_vm2, %v872_v20, %v874_v35 }
  0xc5   : > { %v925_v44 = vadd.f32 %v875_v42, %v828_v38  ;;  %1107 = vrot.lane.b32.xlu1 %v1073_v41, %s1756_s26  ;;  %v972_v45 = vsel %vm962_vm3, %v969_v23, %v971_v39  ;;  %1596 = vmatmul.msk.bf16.gmra.mxu1 %vm439_vm0, %v1683_v37 }
  0xc6   : > { %v498_v43 = vpop.f32.mrf.mxu0  ;;  %1608 = vmatmul.msk.bf16.gmra.mxu2 %vm439_vm0, %v1683_v37 }
  0xc7   : > { %v1022_v46 = vadd.f32 %v972_v45, %v925_v44  ;;  %1620 = vmatmul.msk.bf16.gmra.mxu3 %vm439_vm0, %v1683_v37 }
  0xc9   : > { %1584 = vmatmul.msk.bf16.gmra.mxu0 %vm439_vm0, %v1683_v37  ;;  %v630_v47 = vpop.f32.mrf.mxu2  ;;  %v1959_v48 = vadd.f32 %v1917_v55, %v1022_v46 }
  0xca   : > { %v699_v49 = vpop.f32.mrf.mxu3  ;;  %v563_v50 = vpop.f32.mrf.mxu1  ;;  %v876_v58 = vrot.slane %v630_v47, 2 }
  0xcb   : > { %v1074_v51 = vmax.f32 %v1959_v48, 0.0  ;;  %v780_v52 = vrot.slane %v563_v50, 1  ;;  %v973_v1 = vrot.slane %v699_v49, 3 }
  0xcd   : > { %1109 = vrot.lane.b32.xlu1 %v1074_v51, %s1756_s26  ;;  %v781_v56 = vsel %vm768_vm1, %v779_v54, %v780_v52 }
  0xce   : > { %v500_v53 = vpop.f32.mrf.mxu0  ;;  %v829_v62 = vadd.f32 %v781_v56, %v498_v43 }
  0xd1   : > { %v632_v57 = vpop.f32.mrf.mxu2 }
  0xd2   : > { %v877_v59 = vrot.slane %v632_v57, 2  ;;  %v701_v61 = vpop.f32.mrf.mxu3  ;;  %v566_v0 = vpop.f32.mrf.mxu1 }
  0xd3   : > { %v974_v63 = vrot.slane %v701_v61, 3  ;;  %v782_v3 = vrot.slane %v566_v0, 1 }
  0xd4   : > { %v878_v2 = vsel %vm865_vm2, %v876_v58, %v877_v59 }
  0xd5   : > { %v926_v5 = vadd.f32 %v878_v2, %v829_v62  ;;  %v975_v6 = vsel %vm962_vm3, %v973_v1, %v974_v63  ;;  %v783_v8 = vsel %vm768_vm1, %v780_v52, %v782_v3 }
  0xd6   : > { %v503_v4 = vpop.f32.mrf.mxu0  ;;  %v830_v14 = vadd.f32 %v783_v8, %v500_v53 }
  0xd7   : > { %v1023_v7 = vadd.f32 %v975_v6, %v926_v5 }
  0xd9   : > { %v635_v10 = vpop.f32.mrf.mxu2  ;;  %v1968_v11 = vadd.f32 %v1917_v55, %v1023_v7 }
  0xda   : > { %v879_v12 = vrot.slane %v635_v10, 2  ;;  %v704_v13 = vpop.f32.mrf.mxu3  ;;  %v568_v16 = vpop.f32.mrf.mxu1 }
  0xdb   : > { %v976_v15 = vrot.slane %v704_v13, 3  ;;  %v1075_v17 = vmax.f32 %v1968_v11, 0.0  ;;  %v784_v30 = vrot.slane %v568_v16, 1  ;;  %1722 = vtanh.f32 %v1968_v11 }
  0xdc   : > { %v880_v18 = vsel %vm865_vm2, %v877_v59, %v879_v12  ;;  %1724 = vtanh.f32 %v1959_v48 }
  0xdd   : > { %v927_v20 = vadd.f32 %v880_v18, %v830_v14  ;;  %1111 = vrot.lane.b32.xlu2 %v1075_v17, %s1756_s26  ;;  %v977_v21 = vsel %vm962_vm3, %v974_v63, %v976_v15 }
  0xde   : > { %v504_v19 = vpop.f32.mrf.mxu0 }
  0xdf   : > { %v1024_v22 = vadd.f32 %v977_v21, %v927_v20 }
  0xe1   : > { %v637_v23 = vpop.f32.mrf.mxu2  ;;  %v1975_v24 = vadd.f32 %v1917_v55, %v1024_v22 }
  0xe2   : > { %v706_v25 = vpop.f32.mrf.mxu3  ;;  %v571_v26 = vpop.f32.mrf.mxu1  ;;  %v881_v33 = vrot.slane %v637_v23, 2 }
  0xe3   : > { %v1076_v27 = vmax.f32 %v1975_v24, 0.0  ;;  %v785_v28 = vrot.slane %v571_v26, 1  ;;  %v978_v40 = vrot.slane %v706_v25, 3  ;;  %1726 = vtanh.f32 %v1975_v24 }
  0xe5   : > { %1113 = vrot.lane.b32.xlu2 %v1076_v27, %s1756_s26  ;;  %v786_v31 = vsel %vm768_vm1, %v784_v30, %v785_v28 }
  0xe6   : > { %v507_v29 = vpop.f32.mrf.mxu0  ;;  %v831_v37 = vadd.f32 %v786_v31, %v504_v19 }
  0xe9   : > { %v640_v32 = vpop.f32.mrf.mxu2 }
  0xea   : > { %v882_v35 = vrot.slane %v640_v32, 2  ;;  %v709_v36 = vpop.f32.mrf.mxu3  ;;  %v573_v39 = vpop.f32.mrf.mxu1 }
  0xeb   : > { %v979_v38 = vrot.slane %v709_v36, 3  ;;  %v787_v42 = vrot.slane %v573_v39, 1 }
  0xec   : > { %v883_v41 = vsel %vm865_vm2, %v881_v33, %v882_v35 }
  0xed   : > { %v928_v44 = vadd.f32 %v883_v41, %v831_v37  ;;  %v980_v45 = vsel %vm962_vm3, %v978_v40, %v979_v38  ;;  %v788_v47 = vsel %vm768_vm1, %v785_v28, %v787_v42 }
  0xee   : > { %v509_v43 = vpop.f32.mrf.mxu0  ;;  %v832_v53 = vadd.f32 %v788_v47, %v507_v29 }
  0xef   : > { %v1025_v46 = vadd.f32 %v980_v45, %v928_v44 }
  0xf1   : > { %v642_v49 = vpop.f32.mrf.mxu2  ;;  %v1984_v50 = vadd.f32 %v1917_v55, %v1025_v46 }
  0xf2   : > { %v884_v51 = vrot.slane %v642_v49, 2  ;;  %v711_v52 = vpop.f32.mrf.mxu3  ;;  %v576_v56 = vpop.f32.mrf.mxu1 }
  0xf3   : > { %v981_v54 = vrot.slane %v711_v52, 3  ;;  %v1077_v57 = vmax.f32 %v1984_v50, 0.0  ;;  %v789_v7 = vrot.slane %v576_v56, 1  ;;  %1728 = vtanh.f32 %v1984_v50 }
  0xf4   : > { %v885_v58 = vsel %vm865_vm2, %v882_v35, %v884_v51 }
  0xf5   : > { %v929_v61 = vadd.f32 %v885_v58, %v832_v53  ;;  %1115 = vrot.lane.b32.xlu0 %v1077_v57, %s1756_s26  ;;  %v982_v62 = vsel %vm962_vm3, %v979_v38, %v981_v54 }
  0xf6   : > { %v511_v59 = vpop.f32.mrf.mxu0 }
  0xf7   : > { %v1026_v63 = vadd.f32 %v982_v62, %v929_v61 }
  0xf9   : > { %v645_v0 = vpop.f32.mrf.mxu2  ;;  %v1991_v1 = vadd.f32 %v1917_v55, %v1026_v63 }
  0xfa   : > { %v714_v2 = vpop.f32.mrf.mxu3  ;;  %v578_v3 = vpop.f32.mrf.mxu1  ;;  %v886_v12 = vrot.slane %v645_v0, 2 }
  0xfb   : > { %v1078_v4 = vmax.f32 %v1991_v1, 0.0  ;;  %v790_v5 = vrot.slane %v578_v3, 1  ;;  %v983_v18 = vrot.slane %v714_v2, 3  ;;  %v1695_v3 = vld [vmem:[%s2172_s4 + $0x18] sm:$0xff]  ;;  %1730 = vtanh.f32 %v1991_v1 }
  0xfc   : > { %1340 = vmatpush.bf16.msrb.mxu0 %v1695_v3 }
  0xfd   : > { %1117 = vrot.lane.b32.xlu1 %v1078_v4, %s1756_s26  ;;  %v791_v8 = vsel %vm768_vm1, %v789_v7, %v790_v5 }
  0xfe   : > { %v513_v6 = vpop.f32.mrf.mxu0  ;;  %v833_v15 = vadd.f32 %v791_v8, %v511_v59 }
 0x100   : > { %1341 = vmatpush.bf16.msrb.mxu0 %v1694_v34 }
 0x101   : > { %v647_v10 = vpop.f32.mrf.mxu2 }
 0x102   : > { %v887_v13 = vrot.slane %v647_v10, 2  ;;  %v716_v14 = vpop.f32.mrf.mxu3  ;;  %v581_v17 = vpop.f32.mrf.mxu1 }
 0x103   : > { %v984_v16 = vrot.slane %v716_v14, 3  ;;  %v792_v20 = vrot.slane %v581_v17, 1 }
 0x104   : > { %v888_v19 = vsel %vm865_vm2, %v886_v12, %v887_v13 }
 0x105   : > { %v930_v22 = vadd.f32 %v888_v19, %v833_v15  ;;  %v985_v23 = vsel %vm962_vm3, %v983_v18, %v984_v16  ;;  %v793_v26 = vsel %vm768_vm1, %v790_v5, %v792_v20 }
 0x106   : > { %v516_v21 = vpop.f32.mrf.mxu0  ;;  %v834_v31 = vadd.f32 %v793_v26, %v513_v6  ;;  %v2035_v26 = vld [vmem:[%s2171_s3 + $0x8] sm:$0xff] }
 0x107   : > { %v1027_v25 = vadd.f32 %v985_v23, %v930_v22  ;;  %v2028_v21 = vld [vmem:[%s2171_s3] sm:$0xff] }
 0x109   : > { %v650_v27 = vpop.f32.mrf.mxu2  ;;  %v2000_v28 = vadd.f32 %v1917_v55, %v1027_v25 }
 0x10a   : > { %v889_v29 = vrot.slane %v650_v27, 2  ;;  %v719_v30 = vpop.f32.mrf.mxu3  ;;  %v583_v33 = vpop.f32.mrf.mxu1 }
 0x10b   : > { %v986_v32 = vrot.slane %v719_v30, 3  ;;  %v1079_v35 = vmax.f32 %v2000_v28, 0.0  ;;  %v794_v49 = vrot.slane %v583_v33, 1  ;;  %1732 = vtanh.f32 %v2000_v28 }
 0x10c   : > { %v890_v36 = vsel %vm865_vm2, %v887_v13, %v889_v29  ;;  %v1717_v13 = vpop.eup %1716 }
 0x10d   : > { %v931_v38 = vadd.f32 %v890_v36, %v834_v31  ;;  %1119 = vrot.lane.b32.xlu2 %v1079_v35, %s1756_s26  ;;  %v987_v39 = vsel %vm962_vm3, %v984_v16, %v986_v32  ;;  %v1719_v23 = vpop.eup %1718 }
 0x10e   : > { %v517_v37 = vpop.f32.mrf.mxu0  ;;  %v1721_v11 = vpop.eup %1720 }
 0x10f   : > { %v1028_v40 = vadd.f32 %v987_v39, %v931_v38 }
 0x111   : > { %v652_v41 = vpop.f32.mrf.mxu2  ;;  %v2007_v42 = vadd.f32 %v1917_v55, %v1028_v40 }
 0x112   : > { %v721_v43 = vpop.f32.mrf.mxu3  ;;  %v586_v44 = vpop.f32.mrf.mxu1  ;;  %v891_v53 = vrot.slane %v652_v41, 2 }
 0x113   : > { %v1080_v45 = vmax.f32 %v2007_v42, 0.0  ;;  %v795_v46 = vrot.slane %v586_v44, 1  ;;  %v988_v61 = vrot.slane %v721_v43, 3  ;;  %1734 = vtanh.f32 %v2007_v42  ;;  %v1703_v42 = vld [vmem:[%s2174_s6 + $0x38] sm:$0xff] }
 0x114   : > { %1419 = vmatpush.bf16.msrb.mxu1 %v1703_v42  ;;  %v1698_v42 = vld [vmem:[%s2174_s6 + $0x10] sm:$0xff] }
 0x115   : > { %1121 = vrot.lane.b32.xlu0 %v1080_v45, %s1756_s26  ;;  %v796_v51 = vsel %vm768_vm1, %v794_v49, %v795_v46 }
 0x116   : > { %v520_v47 = vpop.f32.mrf.mxu0  ;;  %v835_v57 = vadd.f32 %v796_v51, %v517_v37 }
 0x119   : > { %v655_v52 = vpop.f32.mrf.mxu2 }
 0x11a   : > { %v892_v54 = vrot.slane %v655_v52, 2  ;;  %v724_v56 = vpop.f32.mrf.mxu3  ;;  %v588_v59 = vpop.f32.mrf.mxu1 }
 0x11b   : > { %v989_v58 = vrot.slane %v724_v56, 3  ;;  %v797_v63 = vrot.slane %v588_v59, 1 }
 0x11c   : > { %v893_v62 = vsel %vm865_vm2, %v891_v53, %v892_v54 }
 0x11d   : > { %v932_v2 = vadd.f32 %v893_v62, %v835_v57  ;;  %v990_v4 = vsel %vm962_vm3, %v988_v61, %v989_v58  ;;  %v798_v7 = vsel %vm768_vm1, %v795_v46, %v797_v63 }
 0x11e   : > { %v522_v0 = vpop.f32.mrf.mxu0  ;;  %v836_v14 = vadd.f32 %v798_v7, %v520_v47 }
 0x11f   : > { %v1029_v5 = vadd.f32 %v990_v4, %v932_v2  ;;  %v1104_v6 = vpop.permute.xlu0 %1103 }
 0x120   : > { %v1151_v18 = vmul.f32 %v1717_v13, %v1104_v6 }
 0x121   : > { %v657_v8 = vpop.f32.mrf.mxu2  ;;  %v2020_v10 = vadd.f32 %v1917_v55, %v1029_v5 }
 0x122   : > { %v894_v12 = vrot.slane %v657_v8, 2  ;;  %v726_v60 = vpop.f32.mrf.mxu3  ;;  %v591_v16 = vpop.f32.mrf.mxu1  ;;  %v1169_v29 = vadd.f32 %v2028_v21, %v1151_v18 }
 0x123   : > { %v991_v15 = vrot.slane %v726_v60, 3  ;;  %v1081_v17 = vmax.f32 %v2020_v10, 0.0  ;;  %v799_v44 = vrot.slane %v591_v16, 1 }
 0x124   : > { %v895_v19 = vsel %vm865_vm2, %v892_v54, %v894_v12  ;;  %v1186_v38 = vsel %vm1185_vm4, %v1169_v29, -inf  ;;  %v1723_v12 = vpop.eup %1722 }
 0x125   : > { %v933_v22 = vadd.f32 %v895_v19, %v836_v14  ;;  %1123 = vrot.lane.b32.xlu1 %v1081_v17, %s1756_s26  ;;  %v992_v9 = vsel %vm962_vm3, %v989_v58, %v991_v15  ;;  %v1725_v24 = vpop.eup %1724 }
 0x126   : > { %v524_v20 = vpop.f32.mrf.mxu0 }
 0x127   : > { %v1030_v25 = vadd.f32 %v992_v9, %v933_v22  ;;  %v1106_v27 = vpop.permute.xlu0 %1105  ;;  %v1727_v9 = vpop.eup %1726 }
 0x128   : > { %v1152_v30 = vmul.f32 %v1719_v23, %v1106_v27 }
 0x129   : > { %v660_v31 = vpop.f32.mrf.mxu2  ;;  %v2039_v32 = vadd.f32 %v1917_v55, %v1030_v25 }
 0x12a   : > { %v1170_v33 = vadd.f32 %v2035_v26, %v1152_v30  ;;  %v729_v35 = vpop.f32.mrf.mxu3  ;;  %v593_v36 = vpop.f32.mrf.mxu1  ;;  %v896_v47 = vrot.slane %v660_v31, 2 }
 0x12b   : > { %v1082_v37 = vmax.f32 %v2039_v32, 0.0  ;;  %v800_v40 = vrot.slane %v593_v36, 1  ;;  %v993_v56 = vrot.slane %v729_v35, 3  ;;  %1736 = vtanh.f32 %v2039_v32 }
 0x12c   : > { %v1187_v39 = vsel %vm1185_vm4, %v1170_v33, -inf  ;;  %1738 = vtanh.f32 %v2020_v10 }
 0x12d   : > { %v1188_v43 = vmax.f32 %v1186_v38, %v1187_v39  ;;  %1125 = vrot.lane.b32.xlu2 %v1082_v37, %s1756_s26  ;;  %v801_v45 = vsel %vm768_vm1, %v799_v44, %v800_v40 }
 0x12e   : > { %v526_v41 = vpop.f32.mrf.mxu0  ;;  %v837_v52 = vadd.f32 %v801_v45, %v524_v20 }
 0x12f   : > { %v1189_v4 = vrot.slane %v1188_v43, 4 }
 0x131   : > { %v662_v46 = vpop.f32.mrf.mxu2  ;;  %v1190_v19 = vmax.f32 %v1188_v43, %v1189_v4 }
 0x132   : > { %v897_v49 = vrot.slane %v662_v46, 2  ;;  %v731_v51 = vpop.f32.mrf.mxu3  ;;  %v596_v54 = vpop.f32.mrf.mxu1 }
 0x133   : > { %v994_v53 = vrot.slane %v731_v51, 3  ;;  %v802_v58 = vrot.slane %v596_v54, 1  ;;  %v1191_v35 = vrot.slane %v1190_v19, 2 }
 0x134   : > { %v898_v57 = vsel %vm865_vm2, %v896_v47, %v897_v49 }
 0x135   : > { %v934_v61 = vadd.f32 %v898_v57, %v837_v52  ;;  %v995_v62 = vsel %vm962_vm3, %v993_v56, %v994_v53  ;;  %v803_v3 = vsel %vm768_vm1, %v800_v40, %v802_v58  ;;  %v1192_v52 = vmax.f32 %v1190_v19, %v1191_v35 }
 0x136   : > { %v529_v59 = vpop.f32.mrf.mxu0  ;;  %v838_v60 = vadd.f32 %v803_v3, %v526_v41 }
 0x137   : > { %v1031_v63 = vadd.f32 %v995_v62, %v934_v61  ;;  %v1108_v0 = vpop.permute.xlu1 %1107  ;;  %v1112_v2 = vpop.permute.xlu2 %1111  ;;  %v1193_v61 = vrot.slane %v1192_v52, 1 }
 0x138   : > { %v1153_v13 = vmul.f32 %v1721_v11, %v1108_v0  ;;  %v1155_v16 = vmul.f32 %v1723_v12, %v1112_v2 }
 0x139   : > { %v665_v5 = vpop.f32.mrf.mxu2  ;;  %v2057_v6 = vadd.f32 %v1917_v55, %v1031_v63 }
 0x13a   : > { %v899_v7 = vrot.slane %v665_v5, 2  ;;  %v734_v8 = vpop.f32.mrf.mxu3  ;;  %v598_v48 = vpop.f32.mrf.mxu1  ;;  %v1171_v23 = vadd.f32 %v2028_v21, %v1153_v13  ;;  %v1173_v30 = vadd.f32 %v2028_v21, %v1155_v16 }
 0x13b   : > { %v996_v14 = vrot.slane %v734_v8, 3  ;;  %v1083_v15 = vmax.f32 %v2057_v6, 0.0  ;;  %v804_v56 = vrot.slane %v598_v48, 1  ;;  %v1194_v48 = vmax.f32 %v1192_v52, %v1193_v61 }
 0x13c   : > { %v900_v17 = vsel %vm865_vm2, %v897_v49, %v899_v7  ;;  %v1195_v41 = vsel %vm1185_vm4, %v1171_v23, -inf  ;;  %v1204_v45 = vsel %vm1185_vm4, %v1173_v30, -inf  ;;  %1740 = vtanh.f32 %v2057_v6 }
 0x13d   : > { %v935_v20 = vadd.f32 %v900_v17, %v838_v60  ;;  %1127 = vrot.lane.b32.xlu0 %v1083_v15, %s1756_s26  ;;  %v997_v22 = vsel %vm962_vm3, %v994_v53, %v996_v14  ;;  %v1258_v23 = vpack.c.bf16 %v1194_v48, %v1194_v48 }
 0x13e   : > { %v530_v18 = vpop.f32.mrf.mxu0 }
 0x13f   : > { %v1032_v25 = vadd.f32 %v997_v22, %v935_v20  ;;  %v1110_v27 = vpop.permute.xlu1 %1109  ;;  %v1114_v29 = vpop.permute.xlu2 %1113 }
 0x140   : > { %v1154_v31 = vmul.f32 %v1725_v24, %v1110_v27  ;;  %v1156_v33 = vmul.f32 %v1727_v9, %v1114_v29 }
 0x141   : > { %v667_v36 = vpop.f32.mrf.mxu2  ;;  %v2067_v37 = vadd.f32 %v1917_v55, %v1032_v25 }
 0x142   : > { %v1172_v38 = vadd.f32 %v2035_v26, %v1154_v31  ;;  %v1174_v39 = vadd.f32 %v2035_v26, %v1156_v33  ;;  %v736_v40 = vpop.f32.mrf.mxu3  ;;  %v601_v43 = vpop.f32.mrf.mxu1  ;;  %v901_v2 = vrot.slane %v667_v36, 2 }
 0x143   : > { %v1084_v44 = vmax.f32 %v2067_v37, 0.0  ;;  %v805_v49 = vrot.slane %v601_v43, 1  ;;  %v998_v12 = vrot.slane %v736_v40, 3  ;;  %1742 = vtanh.f32 %v2067_v37 }
 0x144   : > { %v1196_v46 = vsel %vm1185_vm4, %v1172_v38, -inf  ;;  %v1205_v47 = vsel %vm1185_vm4, %v1174_v39, -inf }
 0x145   : > { %v1197_v53 = vmax.f32 %v1195_v41, %v1196_v46  ;;  %v1206_v54 = vmax.f32 %v1204_v45, %v1205_v47  ;;  %1129 = vrot.lane.b32.xlu1 %v1084_v44, %s1756_s26  ;;  %v806_v59 = vsel %vm768_vm1, %v804_v56, %v805_v49  ;;  %v1286_v41 = vunpack.c.l.b16 %v1258_v23  ;;  %v1729_v56 = vpop.eup %1728 }
 0x146   : > { %v533_v51 = vpop.f32.mrf.mxu0  ;;  %v839_v11 = vadd.f32 %v806_v59, %v530_v18 }
 0x147   : > { %v1198_v57 = vrot.slane %v1197_v53, 4  ;;  %v1207_v58 = vrot.slane %v1206_v54, 4 }
 0x149   : > { %v1199_v62 = vmax.f32 %v1197_v53, %v1198_v57  ;;  %v1208_v63 = vmax.f32 %v1206_v54, %v1207_v58  ;;  %v670_v0 = vpop.f32.mrf.mxu2  ;;  %v1731_v58 = vpop.eup %1730 }
 0x14a   : > { %v902_v3 = vrot.slane %v670_v0, 2  ;;  %v739_v34 = vpop.f32.mrf.mxu3  ;;  %v603_v8 = vpop.f32.mrf.mxu1 }
 0x14b   : > { %v1200_v4 = vrot.slane %v1199_v62, 2  ;;  %v1209_v5 = vrot.slane %v1208_v63, 2  ;;  %v999_v7 = vrot.slane %v739_v34, 3  ;;  %v807_v13 = vrot.slane %v603_v8, 1  ;;  %v1733_v8 = vpop.eup %1732 }
 0x14c   : > { %v903_v60 = vsel %vm865_vm2, %v901_v2, %v902_v3 }
 0x14d   : > { %v1201_v15 = vmax.f32 %v1199_v62, %v1200_v4  ;;  %v1210_v16 = vmax.f32 %v1208_v63, %v1209_v5  ;;  %v936_v17 = vadd.f32 %v903_v60, %v839_v11  ;;  %v1000_v19 = vsel %vm962_vm3, %v998_v12, %v999_v7  ;;  %v1693_v5 = vld [vmem:[%s2172_s4 + $0x8] sm:$0xff] }
 0x14e   : > { %v535_v14 = vpop.f32.mrf.mxu0  ;;  %v808_v9 = vsel %vm768_vm1, %v805_v49, %v807_v13  ;;  %1342 = vmatpush.bf16.msrb.mxu0 %v1693_v5 }
 0x14f   : > { %v1202_v20 = vrot.slane %v1201_v15, 1  ;;  %v1211_v24 = vrot.slane %v1210_v16, 1  ;;  %v1033_v22 = vadd.f32 %v1000_v19, %v936_v17  ;;  %v840_v30 = vadd.f32 %v808_v9, %v533_v51  ;;  %v1735_v14 = vpop.eup %1734 }
 0x151   : > { %v1203_v18 = vmax.f32 %v1201_v15, %v1202_v20  ;;  %v1212_v25 = vmax.f32 %v1210_v16, %v1211_v24  ;;  %v672_v27 = vpop.f32.mrf.mxu2  ;;  %v2082_v29 = vadd.f32 %v1917_v55, %v1033_v22 }
 0x152   : > { %v904_v31 = vrot.slane %v672_v27, 2  ;;  %v741_v33 = vpop.f32.mrf.mxu3 }
 0x153   : > { %v1259_v35 = vpack.c.bf16 %v1203_v18, %v1203_v18  ;;  %v1260_v36 = vpack.c.bf16 %v1212_v25, %v1212_v25  ;;  %v1001_v38 = vrot.slane %v741_v33, 3  ;;  %v1085_v39 = vmax.f32 %v2082_v29, 0.0  ;;  %v1737_v18 = vpop.eup %1736 }
 0x154   : > { %v905_v40 = vsel %vm865_vm2, %v902_v3, %v904_v31  ;;  %v1739_v31 = vpop.eup %1738  ;;  %1744 = vtanh.f32 %v2082_v29  ;;  %v1699_v29 = vld [vmem:[%s2174_s6 + $0x18] sm:$0xff] }
 0x155   : > { %v1287_v43 = vunpack.c.l.b16 %v1259_v35  ;;  %v1288_v44 = vunpack.c.l.b16 %v1260_v36  ;;  %v937_v45 = vadd.f32 %v905_v40, %v840_v30  ;;  %1131 = vrot.lane.b32.xlu2 %v1085_v39, %s1756_s26  ;;  %v1002_v46 = vsel %vm962_vm3, %v999_v7, %v1001_v38 }
 0x157   : > { %v1295_v47 = vsel %vm1294_vm5, %v1287_v43, %v1286_v41  ;;  %v1034_v49 = vadd.f32 %v1002_v46, %v937_v45 }
 0x158   : > { %v1297_v51 = vsel %vm1296_vm6, %v1288_v44, %v1295_v47 }
 0x159   : > { %v2089_v52 = vadd.f32 %v1917_v55, %v1034_v49 }
 0x15b   : > { %v1086_v53 = vmax.f32 %v2089_v52, 0.0  ;;  %1746 = vtanh.f32 %v2089_v52 }
 0x15d   : > { %1133 = vrot.lane.b32.xlu0 %v1086_v53, %s1756_s26 }
 0x167   : > { %v1116_v54 = vpop.permute.xlu0 %1115  ;;  %v1120_v11 = vpop.permute.xlu2 %1119 }
 0x168   : > { %v1157_v57 = vmul.f32 %v1729_v56, %v1116_v54  ;;  %v1159_v60 = vmul.f32 %v1733_v8, %v1120_v11  ;;  %v1701_v8 = vld [vmem:[%s2174_s6 + $0x28] sm:$0xff] }
 0x16a   : > { %v1175_v61 = vadd.f32 %v2028_v21, %v1157_v57  ;;  %v1177_v28 = vadd.f32 %v2028_v21, %v1159_v60 }
 0x16c   : > { %v1213_v55 = vsel %vm1185_vm4, %v1175_v61, -inf  ;;  %v1222_v19 = vsel %vm1185_vm4, %v1177_v28, -inf }
 0x16f   : > { %v1118_v59 = vpop.permute.xlu1 %1117 }
 0x170   : > { %v1158_v62 = vmul.f32 %v1731_v58, %v1118_v59  ;;  %v1692_v58 = vld [vmem:[%s2172_s4] sm:$0xff]  ;;  %v1702_v59 = vld [vmem:[%s2174_s6 + $0x30] sm:$0xff] }
 0x171   : > { %1343 = vmatpush.bf16.msrb.mxu0 %v1692_v58  ;;  %1420 = vmatpush.bf16.msrb.mxu1 %v1702_v59 }
 0x172   : > { %v1176_v63 = vadd.f32 %v2035_v26, %v1158_v62 }
 0x174   : > { %v1214_v0 = vsel %vm1185_vm4, %v1176_v63, -inf  ;;  %v1741_v63 = vpop.eup %1740 }
 0x175   : > { %v1215_v2 = vmax.f32 %v1213_v55, %v1214_v0  ;;  %v1743_v0 = vpop.eup %1742  ;;  %1421 = vmatpush.bf16.msrb.mxu1 %v1701_v8 }
 0x177   : > { %v1216_v3 = vrot.slane %v1215_v2, 4 }
 0x179   : > { %v1217_v34 = vmax.f32 %v1215_v2, %v1216_v3 }
 0x17b   : > { %v1218_v50 = vrot.slane %v1217_v34, 2 }
 0x17d   : > { %v1219_v1 = vmax.f32 %v1217_v34, %v1218_v50 }
 0x17f   : > { %v1220_v4 = vrot.slane %v1219_v1, 1 }
 0x181   : > { %v1221_v7 = vmax.f32 %v1219_v1, %v1220_v4 }
 0x183   : > { %v1261_v12 = vpack.c.bf16 %v1221_v7, %v1221_v7 }
 0x185   : > { %v1289_v13 = vunpack.c.l.b16 %v1261_v12 }
 0x187   : > { %v1299_v48 = vsel %vm1298_vm7, %v1289_v13, %v1297_v51  ;;  %v1122_v15 = vpop.permute.xlu0 %1121  ;;  %v1126_v23 = vpop.permute.xlu2 %1125 }
 0x188   : > { %v1160_v16 = vmul.f32 %v1735_v14, %v1122_v15  ;;  %v1162_v27 = vmul.f32 %v1737_v18, %v1126_v23  ;;  %v1700_v14 = vld [vmem:[%s2174_s6 + $0x20] sm:$0xff]  ;;  %v1697_v18 = vld [vmem:[%s2174_s6 + $0x8] sm:$0xff] }
 0x189   : > { %1422 = vmatpush.bf16.msrb.mxu1 %v1700_v14 }
 0x18a   : > { %v1178_v17 = vadd.f32 %v2035_v26, %v1160_v16  ;;  %v1180_v36 = vadd.f32 %v2035_v26, %v1162_v27 }
 0x18c   : > { %v1223_v20 = vsel %vm1185_vm4, %v1178_v17, -inf  ;;  %v1232_v41 = vsel %vm1185_vm4, %v1180_v36, -inf }
 0x18d   : > { %v1224_v24 = vmax.f32 %v1222_v19, %v1223_v20  ;;  %1423 = vmatpush.bf16.msrb.mxu1 %v1699_v29 }
 0x18f   : > { %v1225_v22 = vrot.slane %v1224_v24, 4 }
 0x191   : > { %v1226_v9 = vmax.f32 %v1224_v24, %v1225_v22  ;;  %1424 = vmatpush.bf16.msrb.mxu1 %v1698_v42 }
 0x193   : > { %v1227_v25 = vrot.slane %v1226_v9, 2 }
 0x195   : > { %v1228_v30 = vmax.f32 %v1226_v9, %v1227_v25  ;;  %1425 = vmatpush.bf16.msrb.mxu1 %v1697_v18 }
 0x197   : > { %v1229_v33 = vrot.slane %v1228_v30, 1  ;;  %v1124_v35 = vpop.permute.xlu1 %1123 }
 0x198   : > { %v1161_v32 = vmul.f32 %v1739_v31, %v1124_v35 }
 0x199   : > { %v1230_v38 = vmax.f32 %v1228_v30, %v1229_v33 }
 0x19a   : > { %v1179_v39 = vadd.f32 %v2028_v21, %v1161_v32 }
 0x19b   : > { %v1262_v40 = vpack.c.bf16 %v1230_v38, %v1230_v38 }
 0x19c   : > { %v1231_v43 = vsel %vm1185_vm4, %v1179_v39, -inf }
 0x19d   : > { %v1290_v10 = vunpack.c.l.b16 %v1262_v40  ;;  %v1233_v44 = vmax.f32 %v1231_v43, %v1232_v41  ;;  %v1714_v40 = vld [vmem:[%s2173_s5] ss:$0 sm:$0xff] }
 0x19f   : > { %v1301_v45 = vsel %vm1300_vm8, %v1290_v10, %v1299_v48  ;;  %v1234_v46 = vrot.slane %v1233_v44, 4  ;;  %v1745_v48 = vpop.eup %1744 }
 0x1a0   : > { %v1747_v17 = vpop.eup %1746 }
 0x1a1   : > { %v1235_v47 = vmax.f32 %v1233_v44, %v1234_v46  ;;  %v1715_v46 = vld [vmem:[%s2175_s7] ss:$0 sm:$0xff] }
 0x1a3   : > { %v1236_v49 = vrot.slane %v1235_v47, 2 }
 0x1a5   : > { %v1237_v51 = vmax.f32 %v1235_v47, %v1236_v49 }
 0x1a7   : > { %v1238_v53 = vrot.slane %v1237_v51, 1 }
 0x1a9   : > { %v1239_v54 = vmax.f32 %v1237_v51, %v1238_v53 }
 0x1ab   : > { %v1263_v56 = vpack.c.bf16 %v1239_v54, %v1239_v54 }
 0x1ad   : > { %v1291_v57 = vunpack.c.l.b16 %v1263_v56 }
 0x1af   : > { %v1303_v61 = vsel %vm1302_vm9, %v1291_v57, %v1301_v45  ;;  %v1128_v62 = vpop.permute.xlu0 %1127  ;;  %v1132_v60 = vpop.permute.xlu2 %1131 }
 0x1b0   : > { %v1163_v55 = vmul.f32 %v1741_v63, %v1128_v62  ;;  %v1165_v28 = vmul.f32 %v1745_v48, %v1132_v60 }
 0x1b2   : > { %v1181_v6 = vadd.f32 %v2028_v21, %v1163_v55  ;;  %v1183_v24 = vadd.f32 %v2028_v21, %v1165_v28  ;;  %v1696_v21 = vld [vmem:[%s2174_s6] sm:$0xff] }
 0x1b3   : > { %1426 = vmatpush.bf16.msrb.mxu1 %v1696_v21 }
 0x1b4   : > { %v1240_v50 = vsel %vm1185_vm4, %v1181_v6, -inf  ;;  %v1249_v9 = vsel %vm1185_vm4, %v1183_v24, -inf }
 0x1b7   : > { %v1130_v2 = vpop.permute.xlu1 %1129 }
 0x1b8   : > { %v1164_v3 = vmul.f32 %v1743_v0, %v1130_v2 }
 0x1ba   : > { %v1182_v34 = vadd.f32 %v2035_v26, %v1164_v3 }
 0x1bc   : > { %v1241_v1 = vsel %vm1185_vm4, %v1182_v34, -inf }
 0x1bd   : > { %v1242_v4 = vmax.f32 %v1240_v50, %v1241_v1 }
 0x1bf   : > { %v1243_v5 = vrot.slane %v1242_v4, 4 }
 0x1c1   : > { %v1244_v11 = vmax.f32 %v1242_v4, %v1243_v5 }
 0x1c3   : > { %v1245_v7 = vrot.slane %v1244_v11, 2 }
 0x1c5   : > { %v1246_v37 = vmax.f32 %v1244_v11, %v1245_v7 }
 0x1c7   : > { %v1247_v12 = vrot.slane %v1246_v37, 1 }
 0x1c9   : > { %v1248_v13 = vmax.f32 %v1246_v37, %v1247_v12 }
 0x1cb   : > { %v1264_v15 = vpack.c.bf16 %v1248_v13, %v1248_v13 }
 0x1cd   : > { %v1292_v16 = vunpack.c.l.b16 %v1264_v15 }
 0x1cf   : > { %v1134_v19 = vpop.permute.xlu0 %1133  ;;  %v1305_v20 = vsel %vm1304_vm10, %v1292_v16, %v1303_v61 }
 0x1d0   : > { %v1166_v52 = vmul.f32 %v1747_v17, %v1134_v19 }
 0x1d2   : > { %v1184_v22 = vadd.f32 %v2035_v26, %v1166_v52 }
 0x1d4   : > { %v1250_v23 = vsel %vm1185_vm4, %v1184_v22, -inf }
 0x1d5   : > { %v1251_v25 = vmax.f32 %v1249_v9, %v1250_v23 }
 0x1d7   : > { %v1252_v27 = vrot.slane %v1251_v25, 4 }
 0x1d9   : > { %v1253_v30 = vmax.f32 %v1251_v25, %v1252_v27 }
 0x1db   : > { %v1254_v31 = vrot.slane %v1253_v30, 2 }
 0x1dd   : > { %v1255_v26 = vmax.f32 %v1253_v30, %v1254_v31 }
 0x1df   : > { %v1256_v33 = vrot.slane %v1255_v26, 1 }
 0x1e1   : > { %v1257_v35 = vmax.f32 %v1255_v26, %v1256_v33 }
 0x1e3   : > { %v1265_v36 = vpack.c.bf16 %v1257_v35, %v1257_v35 }
 0x1e5   : > { %v1293_v32 = vunpack.c.l.b16 %v1265_v36 }
 0x1e7   : > { %v1307_v38 = vsel %vm1306_vm11, %v1293_v32, %v1305_v20 }
 0x1e8   : > { %v1308_v39 = vpack.c.b16 %v1307_v38, %v1307_v38 }
 0x1ea   : > { %1637 = vmatmul.msk.bf16.vlgmr.msrb.gmra.mxu0 %vm1185_vm4, %v1308_v39 }
 0x267   : > { %v1345_v41 = vpop.f32.mrf.mxu0 }
 0x268   : > { %v1346_v43 = vadd.f32 %v1714_v40, %v1345_v41 }
 0x26a   : > { %v1349_v10 = vmax.f32 %v1346_v43, 0.0 }
 0x26c   : > { %v1350_v44 = vpack.c.bf16 %v1349_v10, %v1349_v10 }
 0x26e   : > { %1427 = vmatmul.bf16.vlgmr.msrb.gmra.mxu1 %v1350_v44 }
 0x26f   : > { %v1347_v45 = vpop.f32.mrf.mxu0 }
 0x2eb   : > { %v1428_v47 = vpop.f32.mrf.mxu1 }
 0x2ec   : > { %v1429_v49 = vadd.f32 %v1715_v46, %v1428_v47 }
 0x2ee   : > { %1432 = vst [vmem:[%s305_s22] sm:$0xff] %v1429_v49 }
 0x2f3   : > { %v1430_v51 = vpop.f32.mrf.mxu1 }
 0x2f4 PF: > { %s18_s27 = sadd.s32 1, %s1754_s27  }
 0x2f5   : > { %p15_p5 = scmp.ge.s32.totalorder %s18_s27, 4  }
 0x2f7   :  { %17 = sbr.rel (!%p15_p5) target bundleno = 1 (0x1), region = 82 }

</bundles_post_ra>
